<compile_context>
chip_gen: v7x
topology: tpu7x:2x2x1
jax: 0.10.0
libtpu: 0.0.40
codegen_flags: <defaults>
</compile_context>

<pallas_src>
import functools

import jax
import jax.numpy as jnp
from jax import lax
from jax.experimental import pallas as pl
from jax.experimental.pallas import tpu as pltpu


def _attention_kernel(x_ref, wqkv_ref, wp_ref, b_ref, o_ref,
                      qkv_ref, pv_ref, *, num_heads, head_dim):
    # x_ref   : (block_b, N, dim)  bf16
    # wqkv_ref: (dim, 3*C)         bf16   columns [3, H, hd]; scale folded in q cols
    # wp_ref  : (C, dim)           bf16
    # b_ref   : (1, dim)           f32
    # o_ref   : (block_b, N, dim)
    # qkv_ref : (block_b, N, 3*C)  bf16 VMEM scratch
    # pv_ref  : (block_b, N, C)    bf16 VMEM scratch (lane-concat PV output)
    block_b, N, dim = x_ref.shape
    H, hd = num_heads, head_dim
    C = H * hd

    # ---- Fused QKV projection: one lane-dense matmul over all block_b*N tokens.
    x_flat = x_ref[...].reshape(block_b * N, dim)
    qkv = jnp.dot(x_flat, wqkv_ref[...],
                  preferred_element_type=jnp.float32)          # (bb*N, 3C) f32 acc
    qkv_ref[...] = qkv.astype(jnp.bfloat16).reshape(block_b, N, 3 * C)

    # ---- Per-batch-element attention (scores / softmax / PV) in a fori_loop so
    # only one element's (H, N, N) scores are live at a time.
    # TODO(synk): for large N (>1-2K tokens, ~half that on v7x) switch to a
    # KV-tiled online-softmax accumulator instead of full (H, N, N) scores.
    def body(b, carry):
        qkv_b = qkv_ref[b]                                     # (N, 3C) bf16
        # Column layout matches torch's reshape(B, N, 3, H, hd): [3, H, hd].
        q = qkv_b[:, 0 * C:1 * C].reshape(N, H, hd)            # scale already folded
        k = qkv_b[:, 1 * C:2 * C].reshape(N, H, hd)
        v = qkv_b[:, 2 * C:3 * C].reshape(N, H, hd)

        # Scores, batched over heads, contraction over head_dim.
        s = jnp.einsum('nhd,mhd->hnm', q, k,
                       preferred_element_type=jnp.float32)     # (H, N, N) f32
        # Numerically-stable softmax numerator (normalization deferred).
        s = s - jnp.max(s, axis=-1, keepdims=True)
        p = jnp.exp(s)                                         # in (0, 1]
        l = jnp.sum(p, axis=-1, keepdims=True)                 # (H, N, 1)
        # attn_drop(p=0.0) -> identity

        o = jnp.einsum('hnm,mhd->hnd', p.astype(jnp.bfloat16), v,
                       preferred_element_type=jnp.float32)     # (H, N, hd) f32
        # Deferred normalization on the small (H, N, hd) tensor (EUP recip).
        o = o * pl.reciprocal(l, approx=True)

        # Head-major -> lane-concat relayout; store bf16 for the fused proj.
        pv_ref[b] = jnp.transpose(o, (1, 0, 2)).reshape(N, C).astype(jnp.bfloat16)
        return carry

    lax.fori_loop(0, block_b, body, 0, unroll=False)

    # ---- Fused output projection: one (bb*N, C) @ (C, dim) matmul + bias.
    pv_flat = pv_ref[...].reshape(block_b * N, C)
    out = jnp.dot(pv_flat, wp_ref[...],
                  preferred_element_type=jnp.float32) + b_ref[...]
    # proj_drop(p=0.0) -> identity
    o_ref[...] = out.reshape(block_b, N, dim).astype(o_ref.dtype)


def _vmem_limit_bytes():
    """Chip-aware scoped-VMEM request with headroom (96 MiB cap)."""
    cap = 128 * 1024 * 1024
    try:
        info = pltpu.get_tpu_info()
        cap = int(getattr(info, "vmem_capacity_bytes", cap))
    except Exception:
        pass
    return min(cap * 3 // 4, 96 * 1024 * 1024)


def _pick_block_b(B, N, dim, C, H, hd, vmem_limit, out_bytes):
    """Largest block_b dividing B whose estimated per-step VMEM footprint fits."""
    def est(bb):
        io = 2 * bb * N * dim * 2 + 2 * bb * N * dim * out_bytes       # x / out (dbl-buffered)
        wts = 2 * (dim * 3 * C + C * dim) * 2 + 2 * dim * 4            # weights + bias (dbl-buffered)
        scratch = bb * N * 3 * C * 2 + bb * N * C * 2                  # qkv + pv scratch (bf16)
        inter = H * N * N * 4 * 2 + H * N * hd * 4 * 2                 # scores + PV f32 values
        return io + wts + scratch + inter
    for cand in (16, 8, 4, 2, 1):
        if B % cand == 0 and est(cand) <= int(vmem_limit * 0.7):
            return cand
    return 1


def attention_forward(x, w_qkv, w_proj, b_proj, *, num_heads, head_dim,
                      block_b=None):
    """x: (B, N, dim); w_qkv: (dim, 3*C); w_proj: (C, dim); b_proj: (dim,)."""
    B, N, dim = x.shape
    H, hd = num_heads, head_dim
    C = H * hd
    scale = hd ** (-0.5)

    vmem_limit = _vmem_limit_bytes()
    out_bytes = jnp.dtype(x.dtype).itemsize
    if block_b is None:
        block_b = _pick_block_b(B, N, dim, C, H, hd, vmem_limit, out_bytes)
        # Small-VMEM chips (v7x, 64 MiB) have 2 TensorCores: keep the grid
        # length >= 2 so the "parallel" batch axis can shard across them.
        if vmem_limit <= 48 * 1024 * 1024 and (B // block_b) < 2 and block_b > 1:
            for cand in (block_b // 2, block_b // 4, 1):
                if cand >= 1 and B % cand == 0 and (B // cand) >= 2:
                    block_b = cand
                    break
    assert B % block_b == 0

    # Wrapper-side weight prep (done once by XLA):
    #   fold the softmax scale into the q-columns of Wqkv, then cast to bf16.
    w_qkv_scaled = w_qkv.astype(jnp.float32).at[:, 0:C].multiply(scale)
    wqkv_bf = w_qkv_scaled.astype(jnp.bfloat16)                 # (dim, 3C)
    wp_bf = w_proj.astype(jnp.bfloat16)                         # (C, dim)
    bias2 = b_proj.reshape(1, dim).astype(jnp.float32)
    x_bf = x.astype(jnp.bfloat16)
    # TODO(synk): on v5e, emit the kernel output in bf16 if downstream
    # tolerates it (halves output writeback / store-slot pressure).

    kernel = functools.partial(_attention_kernel, num_heads=H, head_dim=hd)

    return pl.pallas_call(
        kernel,
        out_shape=jax.ShapeDtypeStruct((B, N, dim), x.dtype),
        grid_spec=pltpu.PrefetchScalarGridSpec(
            num_scalar_prefetch=0,
            grid=(B // block_b,),
            in_specs=[
                pl.BlockSpec((block_b, N, dim), lambda b: (b, 0, 0)),
                # Constant-index weight blocks stay VMEM-resident across steps.
                # TODO(synk): add pipeline_mode=pl.Buffered(1) on the weight
                # specs to reclaim the double-buffer under v7x's 64 MiB VMEM.
                pl.BlockSpec((dim, 3 * C), lambda b: (0, 0)),
                pl.BlockSpec((C, dim), lambda b: (0, 0)),
                pl.BlockSpec((1, dim), lambda b: (0, 0)),
            ],
            out_specs=pl.BlockSpec((block_b, N, dim), lambda b: (b, 0, 0)),
            scratch_shapes=[
                pltpu.VMEM((block_b, N, 3 * C), jnp.bfloat16),   # packed qkv
                pltpu.VMEM((block_b, N, C), jnp.bfloat16),       # lane-concat PV
            ],
        ),
        compiler_params=pltpu.CompilerParams(
            dimension_semantics=("parallel",),
            vmem_limit_bytes=vmem_limit,
        ),
    )(x_bf, wqkv_bf, wp_bf, bias2)


def attention_reference(x, w_qkv, w_proj, b_proj, *, num_heads, head_dim):
    B, N, dim = x.shape
    C = num_heads * head_dim
    scale = head_dim ** (-0.5)
    qkv = (x @ w_qkv).reshape(B, N, 3, num_heads, head_dim)
    qkv = jnp.transpose(qkv, (2, 0, 3, 1, 4))          # (3, B, H, N, hd)
    q, k, v = qkv[0], qkv[1], qkv[2]
    attn = jnp.einsum("bhnd,bhmd->bhnm", q, k) * scale
    attn = jax.nn.softmax(attn, axis=-1)
    out = jnp.einsum("bhnm,bhmd->bhnd", attn, v)       # (B, H, N, hd)
    out = jnp.transpose(out, (0, 2, 1, 3)).reshape(B, N, C)
    return out @ w_proj + b_proj


if __name__ == "__main__":
    # Small deterministic setup consistent with the module:
    #   dim=32, num_heads=4, head_dim=8 -> C = 32
    B, N, dim = 2, 16, 32
    num_heads, head_dim = 4, 8
    C = num_heads * head_dim

    key = jax.random.PRNGKey(0)
    kx, kqkv, kproj, kb = jax.random.split(key, 4)
    x = jax.random.normal(kx, (B, N, dim), dtype=jnp.float32)
    # Deterministic synthetic parameters (qkv has no bias; proj has bias).
    w_qkv = jax.random.normal(kqkv, (dim, 3 * C), dtype=jnp.float32) * 0.05
    w_proj = jax.random.normal(kproj, (C, dim), dtype=jnp.float32) * 0.05
    b_proj = jax.random.normal(kb, (dim,), dtype=jnp.float32) * 0.05

    out = attention_forward(x, w_qkv, w_proj, b_proj,
                            num_heads=num_heads, head_dim=head_dim)
    out = jax.block_until_ready(out)

    ref = attention_reference(x, w_qkv, w_proj, b_proj,
                              num_heads=num_heads, head_dim=head_dim)
    assert out.shape == (B, N, dim)
    # bf16 matmul operands + approx reciprocal vs f32 reference -> loose tol.
    assert jnp.allclose(out, ref, atol=2e-2, rtol=2e-2), "mismatch vs reference"

    print("KERNEL_OK")
</pallas_src>

<mosaic_0001>
module attributes {stable_mosaic.version = 11 : i64} {
  func.func @_attention_kernel(%arg0: i32, %arg1: memref<2x16x32xbf16, #tpu.memory_space<vmem>>, %arg2: memref<32x96xbf16, #tpu.memory_space<vmem>>, %arg3: memref<32x32xbf16, #tpu.memory_space<vmem>>, %arg4: memref<1x32xf32, #tpu.memory_space<vmem>>, %arg5: memref<2x16x32xf32, #tpu.memory_space<vmem>>, %arg6: memref<2x16x96xbf16, #tpu.memory_space<vmem>>, %arg7: memref<2x16x32xbf16, #tpu.memory_space<vmem>>) attributes {dimension_semantics = [#tpu.dimension_semantics<parallel>], iteration_bounds = array<i64: 1>, scalar_prefetch = 0 : i64, scratch_operands = 2 : i64, tpu.core_type = #tpu.core_type<tc>, window_params = [{transform_indices = @transform_0, window_bounds = array<i64: 2, 16, 32>}, {pipeline_mode = #tpu.pipeline_mode<synchronous>, transform_indices = @transform_1, window_bounds = array<i64: 32, 96>}, {pipeline_mode = #tpu.pipeline_mode<synchronous>, transform_indices = @transform_2, window_bounds = array<i64: 32, 32>}, {pipeline_mode = #tpu.pipeline_mode<synchronous>, transform_indices = @transform_3, window_bounds = array<i64: 1, 32>}, {transform_indices = @transform_4, window_bounds = array<i64: 2, 16, 32>}]} {
    %c0 = arith.constant 0 : index
    %c0_0 = arith.constant 0 : index
    %c0_1 = arith.constant 0 : index
    %0 = vector.load %arg1[%c0, %c0_0, %c0_1] : memref<2x16x32xbf16, #tpu.memory_space<vmem>>, vector<2x16x32xbf16>
    %1 = vector.shape_cast %0 : vector<2x16x32xbf16> to vector<32x32xbf16>
    %c0_2 = arith.constant 0 : index
    %c0_3 = arith.constant 0 : index
    %2 = vector.load %arg2[%c0_2, %c0_3] : memref<32x96xbf16, #tpu.memory_space<vmem>>, vector<32x96xbf16>
    %cst = arith.constant dense<0.000000e+00> : vector<32x96xf32>
    %3 = tpu.matmul %1, %2, %cst {dimension_numbers = #tpu.dot_dimension_numbers<[1], [0], [0], [1], [0, 0, 1, 1], [], []>} : vector<32x32xbf16>, vector<32x96xbf16>, vector<32x96xf32> -> vector<32x96xf32>
    %4 = arith.truncf %3 : vector<32x96xf32> to vector<32x96xbf16>
    %5 = vector.shape_cast %4 : vector<32x96xbf16> to vector<2x16x96xbf16>
    %c0_4 = arith.constant 0 : index
    %c0_5 = arith.constant 0 : index
    %c0_6 = arith.constant 0 : index
    %6 = vector.load %arg6[%c0_4, %c0_5, %c0_6] : memref<2x16x96xbf16, #tpu.memory_space<vmem>>, vector<2x16x96xbf16>
    tpu.vector_store %arg6[%c0_4, %c0_5, %c0_6], %5 {strides = array<i32>} : memref<2x16x96xbf16, #tpu.memory_space<vmem>>, vector<2x16x96xbf16>,
    %c0_i32 = arith.constant 0 : i32
    %c2_i32 = arith.constant 2 : i32
    %7 = arith.addi %c0_i32, %c2_i32 : i32
    %c1_i32 = arith.constant 1 : i32
    scf.for %arg8 = %c0_i32 to %7 step %c1_i32  : i32 {
      %17 = arith.index_cast %arg8 : i32 to index
      %c0_19 = arith.constant 0 : index
      %c0_20 = arith.constant 0 : index
      %18 = vector.load %arg6[%17, %c0_19, %c0_20] : memref<2x16x96xbf16, #tpu.memory_space<vmem>>, vector<1x16x96xbf16>
      %19 = vector.shape_cast %18 : vector<1x16x96xbf16> to vector<16x96xbf16>
      %20 = vector.extract_strided_slice %19 {offsets = [0, 0], sizes = [16, 32], strides = [1, 1]} : vector<16x96xbf16> to vector<16x32xbf16>
      %21 = vector.shape_cast %20 : vector<16x32xbf16> to vector<16x4x8xbf16>
      %22 = vector.extract_strided_slice %19 {offsets = [0, 32], sizes = [16, 32], strides = [1, 1]} : vector<16x96xbf16> to vector<16x32xbf16>
      %23 = vector.shape_cast %22 : vector<16x32xbf16> to vector<16x4x8xbf16>
      %24 = vector.extract_strided_slice %19 {offsets = [0, 64], sizes = [16, 32], strides = [1, 1]} : vector<16x96xbf16> to vector<16x32xbf16>
      %25 = vector.shape_cast %24 : vector<16x32xbf16> to vector<16x4x8xbf16>
      "tpu.trace_start"() <{level = 10 : i32, message = "nhd,mhd->hnm"}> : () -> ()
      %cst_21 = arith.constant dense<0.000000e+00> : vector<4x16x16xf32>
      %26 = tpu.matmul %21, %23, %cst_21 {dimension_numbers = #tpu.dot_dimension_numbers<[2], [2], [0], [0], [0, 1, 0, 0, 1, 0], [1], [1]>} : vector<16x4x8xbf16>, vector<16x4x8xbf16>, vector<4x16x16xf32> -> vector<4x16x16xf32>
      "tpu.trace_stop"() : () -> ()
      %cst_22 = arith.constant dense<0xFF800000> : vector<4x16xf32>
      %27 = vector.multi_reduction <maximumf>, %26, %cst_22 [2] : vector<4x16x16xf32> to vector<4x16xf32>
      %28 = vector.shape_cast %27 : vector<4x16xf32> to vector<4x16x1xf32>
      %29 = vector.broadcast %28 : vector<4x16x1xf32> to vector<4x16x16xf32>
      %30 = arith.subf %26, %29 : vector<4x16x16xf32>
      %31 = math.exp %30 : vector<4x16x16xf32>
      %cst_23 = arith.constant dense<0.000000e+00> : vector<4x16xf32>
      %32 = vector.multi_reduction <add>, %31, %cst_23 [2] : vector<4x16x16xf32> to vector<4x16xf32>
      %33 = vector.shape_cast %32 : vector<4x16xf32> to vector<4x16x1xf32>
      %34 = arith.truncf %31 : vector<4x16x16xf32> to vector<4x16x16xbf16>
      "tpu.trace_start"() <{level = 10 : i32, message = "hnm,mhd->hnd"}> : () -> ()
      %cst_24 = arith.constant dense<0.000000e+00> : vector<4x16x8xf32>
      %35 = tpu.matmul %34, %25, %cst_24 {dimension_numbers = #tpu.dot_dimension_numbers<[2], [0], [1], [2], [0, 0, 0, 1, 1, 2], [0], [1]>} : vector<4x16x16xbf16>, vector<16x4x8xbf16>, vector<4x16x8xf32> -> vector<4x16x8xf32>
      "tpu.trace_stop"() : () -> ()
      %36 = tpu.reciprocal %33 {approx = true} : vector<4x16x1xf32> -> vector<4x16x1xf32>
      %37 = vector.broadcast %36 : vector<4x16x1xf32> to vector<4x16x8xf32>
      %38 = arith.mulf %35, %37 : vector<4x16x8xf32>
      %39 = tpu.transpose %38, [1, 0, 2] : vector<4x16x8xf32> -> vector<16x4x8xf32>
      %40 = vector.shape_cast %39 : vector<16x4x8xf32> to vector<16x32xf32>
      %41 = arith.truncf %40 : vector<16x32xf32> to vector<16x32xbf16>
      %42 = arith.index_cast %arg8 : i32 to index
      %c0_25 = arith.constant 0 : index
      %c0_26 = arith.constant 0 : index
      %43 = vector.load %arg7[%42, %c0_25, %c0_26] : memref<2x16x32xbf16, #tpu.memory_space<vmem>>, vector<1x16x32xbf16>
      %44 = vector.shape_cast %43 : vector<1x16x32xbf16> to vector<16x32xbf16>
      %45 = vector.shape_cast %41 : vector<16x32xbf16> to vector<1x16x32xbf16>
      tpu.vector_store %arg7[%42, %c0_25, %c0_26], %45 {strides = array<i32>} : memref<2x16x32xbf16, #tpu.memory_space<vmem>>, vector<1x16x32xbf16>,
    }
    %c2_i32_7 = arith.constant 2 : i32
    %c0_8 = arith.constant 0 : index
    %c0_9 = arith.constant 0 : index
    %c0_10 = arith.constant 0 : index
    %8 = vector.load %arg7[%c0_8, %c0_9, %c0_10] : memref<2x16x32xbf16, #tpu.memory_space<vmem>>, vector<2x16x32xbf16>
    %9 = vector.shape_cast %8 : vector<2x16x32xbf16> to vector<32x32xbf16>
    %c0_11 = arith.constant 0 : index
    %c0_12 = arith.constant 0 : index
    %10 = vector.load %arg3[%c0_11, %c0_12] : memref<32x32xbf16, #tpu.memory_space<vmem>>, vector<32x32xbf16>
    %cst_13 = arith.constant dense<0.000000e+00> : vector<32x32xf32>
    %11 = tpu.matmul %9, %10, %cst_13 {dimension_numbers = #tpu.dot_dimension_numbers<[1], [0], [0], [1], [0, 0, 1, 1], [], []>} : vector<32x32xbf16>, vector<32x32xbf16>, vector<32x32xf32> -> vector<32x32xf32>
    %c0_14 = arith.constant 0 : index
    %c0_15 = arith.constant 0 : index
    %12 = vector.load %arg4[%c0_14, %c0_15] : memref<1x32xf32, #tpu.memory_space<vmem>>, vector<1x32xf32>
    %13 = vector.broadcast %12 : vector<1x32xf32> to vector<32x32xf32>
    %14 = arith.addf %11, %13 : vector<32x32xf32>
    %15 = vector.shape_cast %14 : vector<32x32xf32> to vector<2x16x32xf32>
    %c0_16 = arith.constant 0 : index
    %c0_17 = arith.constant 0 : index
    %c0_18 = arith.constant 0 : index
    %16 = vector.load %arg5[%c0_16, %c0_17, %c0_18] : memref<2x16x32xf32, #tpu.memory_space<vmem>>, vector<2x16x32xf32>
    tpu.vector_store %arg5[%c0_16, %c0_17, %c0_18], %15 {strides = array<i32>} : memref<2x16x32xf32, #tpu.memory_space<vmem>>, vector<2x16x32xf32>,
    return
  }
  func.func @transform_0(%arg0: i32) -> (i32, i32, i32) {
    %c0_i32 = arith.constant 0 : i32
    %c0_i32_0 = arith.constant 0 : i32
    %c0_i32_1 = arith.constant 0 : i32
    return %arg0, %c0_i32, %c0_i32_0 : i32, i32, i32
  }
  func.func @transform_1(%arg0: i32) -> (i32, i32) {
    %c0_i32 = arith.constant 0 : i32
    %c0_i32_0 = arith.constant 0 : i32
    %c0_i32_1 = arith.constant 0 : i32
    return %c0_i32, %c0_i32_0 : i32, i32
  }
  func.func @transform_2(%arg0: i32) -> (i32, i32) {
    %c0_i32 = arith.constant 0 : i32
    %c0_i32_0 = arith.constant 0 : i32
    %c0_i32_1 = arith.constant 0 : i32
    return %c0_i32, %c0_i32_0 : i32, i32
  }
  func.func @transform_3(%arg0: i32) -> (i32, i32) {
    %c0_i32 = arith.constant 0 : i32
    %c0_i32_0 = arith.constant 0 : i32
    %c0_i32_1 = arith.constant 0 : i32
    return %c0_i32, %c0_i32_0 : i32, i32
  }
  func.func @transform_4(%arg0: i32) -> (i32, i32, i32) {
    %c0_i32 = arith.constant 0 : i32
    %c0_i32_0 = arith.constant 0 : i32
    %c0_i32_1 = arith.constant 0 : i32
    return %arg0, %c0_i32, %c0_i32_0 : i32, i32, i32
  }
}

</mosaic_0001>

<bundles_post_ra>
// kernel: tpu_custom_call.1
= control target key start
LH: loop header
LB: loop body
LE: loop exit
PB: predicated region body
PF: predicated region fallthrough
CT: control target
= control target key end

     0   :  { %9 = vsyncpa [#allocation5], 0  ;;  %s1681_s0 = inlined_call_operand.hbm [shape: bf16[2,16,32], index: 0, kind: input, shape index: {}]   ;;  %s1682_s1 = inlined_call_operand.hbm [shape: bf16[32,96], index: 1, kind: input, shape index: {}]   ;;  %s1683_s2 = inlined_call_operand.hbm [shape: bf16[32,32], index: 2, kind: input, shape index: {}]   ;;  %s1684_s3 = inlined_call_operand.hbm [shape: f32[1,32], index: 3, kind: input, shape index: {}]   ;;  %s1685_s4 = inlined_call_operand.hbm [shape: f32[2,16,32], index: 4, kind: output, shape index: {}]  }
   0x1   :  { %10 = vsyncpa [#allocation8], 0 }
   0x2   :  { %11 = vsyncpa [#allocation11], 0 }
   0x3   :  { %12 = vsyncpa [#allocation6], 0  ;;  %s1467_s15 = smov [#allocation7]   ;;  %s1468_s17 = smov [#allocation4]  }
   0x4   :  { %s30_s16 = sshll.u32 %s1467_s15, 4  ;;  %s18_s18 = sshll.u32 %s1468_s17, 4  ;;  %s31_s16 = int_to_ptr.vmem [resolvable:$true] %s30_s16  ;;  %s1513_s18 = int_to_ptr.vmem [resolvable:$true] %s18_s18 }
   0x5   :  { %s1341_s21 = scalar_lea.hbm %s1682_s1, 256 }
   0x6   :  { %p1342_p0 = scmp.ne.s32.totalorder %s1682_s1, %s1341_s21  ;;  %p1345_p1 = scmp.lt.u32.totalorder %s1341_s21, %s1682_s1 }
   0x8   :  { %p1347_p2 = pnand %p1345_p1, %p1342_p0 }
   0xa   :  { %1350 = shalt.err (!%p1347_p2)
}
   0xb   :  { %s1351_s26 = scalar_lea.vmem %s31_s16, 256  ;;  %p1356_p4 = scmp.lt.s32.totalorder %s31_s16, %s31_s16 }
   0xc   :  { %p1352_p3 = scmp.ne.s32.totalorder %s31_s16, %s1351_s26  ;;  %p1357_p5 = scmp.lt.s32.totalorder %s1351_s26, %s1351_s26 }
   0xe   :  { %p1358_p6 = por %p1357_p5, %p1356_p4 }
  0x10   :  { %p1359_p7 = pnand %p1358_p6, %p1352_p3 }
  0x12   :  { %1362 = shalt.err (!%p1359_p7)
}
  0x13   :  { %s1469_s27 = smov 64   ;;  %s1470_s28 = smov 4  }
  0x14   :  { %36 = dma.hbm_to_vmem [thread:$0]  %s1682_s1, 256, %s31_s16, [#allocation8], %s1469_s27, %s1469_s27, %s1470_s28  }
  0x15   :  { %s1363_s7 = scalar_lea.hbm %s1681_s0, 256 }
  0x16   :  { %p1364_p8 = scmp.ne.s32.totalorder %s1681_s0, %s1363_s7  ;;  %p1367_p9 = scmp.lt.u32.totalorder %s1363_s7, %s1681_s0 }
  0x18   :  { %p1369_p10 = pnand %p1367_p9, %p1364_p8 }
  0x1a   :  { %1372 = shalt.err (!%p1369_p10)
}
  0x1b   :  { %s1373_s12 = scalar_lea.vmem %s1513_s18, 256  ;;  %p1378_p12 = scmp.lt.s32.totalorder %s1513_s18, %s1513_s18 }
  0x1c   :  { %p1374_p11 = scmp.ne.s32.totalorder %s1513_s18, %s1373_s12  ;;  %p1379_p13 = scmp.lt.s32.totalorder %s1373_s12, %s1373_s12 }
  0x1e   :  { %p1380_p0 = por %p1379_p13, %p1378_p12 }
  0x20   :  { %p1381_p1 = pnand %p1380_p0, %p1374_p11 }
  0x22   :  { %1384 = shalt.err (!%p1381_p1)
}
  0x23   :  { %24 = dma.hbm_to_vmem [thread:$0]  %s1681_s0, 256, %s1513_s18, [#allocation5], %s1469_s27, %s1469_s27, %s1470_s28  }
  0x24   :  { %s1471_s14 = smov [#allocation9]   ;;  %s1472_s16 = smov [#allocation10]  }
  0x25   :  { %s42_s15 = sshll.u32 %s1471_s14, 4  ;;  %s55_s17 = sshll.u32 %s1472_s16, 4  ;;  %s43_s15 = int_to_ptr.vmem [resolvable:$true] %s42_s15  ;;  %s56_s17 = int_to_ptr.vmem [resolvable:$true] %s55_s17 }
  0x26   :  { %s1385_s21 = scalar_lea.hbm %s1683_s2, 256 }
  0x27   :  { %p1386_p2 = scmp.ne.s32.totalorder %s1683_s2, %s1385_s21  ;;  %p1389_p3 = scmp.lt.u32.totalorder %s1385_s21, %s1683_s2 }
  0x29   :  { %p1391_p4 = pnand %p1389_p3, %p1386_p2 }
  0x2b   :  { %1394 = shalt.err (!%p1391_p4)
}
  0x2c   :  { %s1395_s0 = scalar_lea.vmem %s43_s15, 256  ;;  %p1400_p6 = scmp.lt.s32.totalorder %s43_s15, %s43_s15 }
  0x2d   :  { %p1396_p5 = scmp.ne.s32.totalorder %s43_s15, %s1395_s0  ;;  %p1401_p7 = scmp.lt.s32.totalorder %s1395_s0, %s1395_s0 }
  0x2f   :  { %p1402_p8 = por %p1401_p7, %p1400_p6 }
  0x31   :  { %p1403_p9 = pnand %p1402_p8, %p1396_p5 }
  0x33   :  { %1406 = shalt.err (!%p1403_p9)
}
  0x34   :  { %48 = dma.hbm_to_vmem [thread:$0]  %s1683_s2, 256, %s43_s15, [#allocation8], %s1469_s27, %s1469_s27, %s1470_s28  }
  0x35   :  { %s1407_s5 = scalar_lea.hbm %s1684_s3, 16 }
  0x36   :  { %p1408_p10 = scmp.ne.s32.totalorder %s1684_s3, %s1407_s5  ;;  %p1411_p11 = scmp.lt.u32.totalorder %s1407_s5, %s1684_s3 }
  0x38   :  { %p1413_p12 = pnand %p1411_p11, %p1408_p10 }
  0x3a   :  { %1416 = shalt.err (!%p1413_p12)
}
  0x3b   :  { %s1417_s10 = scalar_lea.vmem %s56_s17, 16  ;;  %s1421_s11 = scalar_lea.vmem %s56_s17, 32 }
  0x3c   :  { %p1418_p13 = scmp.ne.s32.totalorder %s56_s17, %s1417_s10  ;;  %p1422_p0 = scmp.lt.s32.totalorder %s56_s17, %s56_s17 }
  0x3d   :  { %p1423_p1 = scmp.lt.s32.totalorder %s1421_s11, %s1417_s10 }
  0x3f   :  { %p1424_p2 = por %p1423_p1, %p1422_p0 }
  0x41   :  { %p1425_p3 = pnand %p1424_p2, %p1418_p13 }
  0x43   :  { %1428 = shalt.err (!%p1425_p3)
}
  0x44   :  { %58 = dma.hbm_to_vmem [thread:$0]  %s1684_s3, 16, %s56_s17, [#allocation11]  }
  0x45   :  { %1455 = dma.done.wait [#allocation5], 256  }
  0x46   :  { %1456 = vsyncadd [#allocation5], 4294967040 }
  0x47   :  { %1457 = dma.done.wait [#allocation8], 512  }
  0x48   :  { %1458 = vsyncadd [#allocation8], 4294966784 }
  0x49   :  { %1459 = dma.done.wait [#allocation11], 16  }
  0x4a   :  { %1460 = vsyncadd [#allocation11], 4294967280  ;;  %v1288_v0 = vld [vmem:[#allocation7] sm:$0xff]   ;;  %v1289_v1 = vld [vmem:[#allocation7 + $0x8] sm:$0xff]   ;;  %vm102_vm0 = vcmask 261120   ;;  %vm160_vm1 = vcmask 785408  }
  0x4b   :  { %1194 = vmatprep.subr.bf16.mxu0 %v1288_v0  ;;  %v1290_v2 = vld [vmem:[#allocation4] sm:$0xff]   ;;  %v1291_v3 = vld [vmem:[#allocation4 + $0x8] sm:$0xff]   ;;  %s1579_s3 = smov 0  }
  0x4c   :  { %1195 = vmatpush3.bf16.msra.mxu0 %v1288_v0  ;;  %1198 = vmatprep.mubr.msk.bf16.mxu0 %vm102_vm0, %v1290_v2 }
  0x4d   :  { %1196 = vmatprep.subr.bf16.mxu0 %v1289_v1 }
  0x50   :  { %1197 = vmatpush3.bf16.msra.mxu0 %v1289_v1 }
  0x53   :  { %1199 = vmatmul.mubr.msk.bf16.vlgmr.msra.gmra.mrb[0].mxu0 %vm102_vm0, %v1291_v3 }
 0x126   :  { %v1200_v4 = vpop.f32.mrb[0].mxu0 }
 0x127   :  { %v143_v5 = vpop.f32.mrb[1].mxu0 }
 0x128   :  { %v1201_v6 = vpop.f32.mrb[2].mxu0 }
 0x129   :  { %v159_v7 = vpack.c.bf16 %v1201_v6, %v1200_v4  ;;  %v146_v8 = vpop.f32.mrb[3].mxu0 }
 0x12a   :  { %v158_v9 = vpack.c.bf16 %v146_v8, %v143_v5 }
 0x12b   :  { %162 = vst.msk [vmem:[#allocation2 + $0x8] sm:$0xff] %vm160_vm1, %v159_v7 }
 0x12c   :  { %161 = vst.msk [vmem:[#allocation2] sm:$0xff] %vm160_vm1, %v158_v9 }
 0x12d LB: > { %s1151_s28 = sshll.u32 %s1465_s3, 3  ;;  %s1473_s1 = smov 120   ;;  %v1477_v14 = vmov 0.0   ;;  %vm1478_vm2 = vmmov 0   ;;  %vm259_vm3 = vcmask 1043456   ;;  %vm255_vm4 = vcmask 64512   ;;  %s1465_s3 = sphi %s1579_s3, %s168_s3  }
 0x12e   : > { %s170_s12 = scalar_lea.vmem [#allocation2], %s1151_s28  ;;  %s1474_s13 = smov 104   ;;  %1202 = vmatprep.subr.bf16.mxu0 %v1477_v14  ;;  %1208 = vmatprep.subr.bf16.mxu1 %v1477_v14  ;;  %vm445_vm5 = vcmask 130048   ;;  %vm1026_vm6 = vcmask 195584  }
 0x12f   : > { %s1475_s14 = smov 112   ;;  %s1476_s15 = smov 96   ;;  %1204 = vmatprep.mubr.msk.bf16.mxu0 %vm1478_vm2, %v1477_v14  ;;  %1210 = vmatprep.mubr.msk.bf16.mxu1 %vm1478_vm2, %v1477_v14 }
 0x130   : > { %s1479_s16 = smov 64   ;;  %s1482_s17 = smov 16  }
 0x131   : > { %s1483_s19 = smov 8   ;;  %s1484_s20 = smov 24  }
 0x132   : > { %s1031_s21 = scalar_lea.vmem [#allocation3], %s1151_s28  ;;  %s168_s3 = sadd.s32 1, %s1465_s3  }
 0x133   : > { %v171_v10 = vld [vmem:[%s170_s12] sm:$0xff]  ;;  %p165_p4 = scmp.ge.s32.totalorder %s168_s3, 2  }
 0x134   : > { %173 = vrot.lane.b32.xlu0 %v171_v10, %s1473_s1  ;;  %177 = vrot.lane.b32.xlu1 %v171_v10, %s1474_s13  ;;  %s1485_s22 = smov (%p165_p4), [#allocation12]  }
 0x135   :  { %s1122_s23 = sshll.u32 (%p165_p4), %s1485_s22, 4  ;;  %s1123_s23 = int_to_ptr.vmem [resolvable:$true] %s1122_s23 }
 0x136   :  { %s1429_s24 = scalar_lea.vmem (%p165_p4), %s1123_s23, 512  ;;  %p1434_p6 = scmp.lt.s32.totalorder (%p165_p4), %s1123_s23, %s1123_s23 }
 0x137   :  { %p1430_p5 = scmp.ne.s32.totalorder (%p165_p4), %s1123_s23, %s1429_s24  ;;  %p1435_p7 = scmp.lt.s32.totalorder (%p165_p4), %s1429_s24, %s1429_s24 }
 0x138   : > { %175 = vrot.lane.b32.xlu0 %v171_v10, %s1475_s14  ;;  %179 = vrot.lane.b32.xlu1 %v171_v10, %s1476_s15 }
 0x139   :  { %p1436_p8 = por (%p165_p4), %p1435_p7, %p1434_p6 }
 0x13b   :  { %p1437_p9 = pnand (%p165_p4), %p1436_p8, %p1430_p5 }
 0x1a6   : > { %v174_v11 = vpop.permute.xlu0 %173  ;;  %v1587_v12 = vpop.permute.xlu1 %177 }
 0x1a7   : > { %181 = vrot.lane.b32.xlu0 %v174_v11, %s1476_s15 }
 0x1aa   : > { %v1589_v13 = vpop.permute.xlu0 %175  ;;  %v180_v15 = vpop.permute.xlu1 %179 }
 0x1ab   : > { %185 = vrot.lane.b32.xlu0 %v1587_v12, %s1476_s15  ;;  %183 = vrot.lane.b32.xlu1 %v1589_v13, %s1476_s15 }
 0x1ce   : > { %191 = vxpose.xlu1.c.b16.start.end [1/1] (short) (narrow) %v180_v15, 16 }
 0x219   : > { %v182_v16 = vpop.permute.xlu0 %181 }
 0x21a   : > { %207 = vxpose.xlu0.c.b16.start.end [1/1] (short) (narrow) %v182_v16, 16 }
 0x21d   : > { %v184_v17 = vpop.permute.xlu1 %183  ;;  %v186_v18 = vpop.permute.xlu0 %185 }
 0x21e   : > { %223 = vxpose.xlu0.c.b16.start.end [1/1] (short) (narrow) %v184_v17, 16  ;;  %239 = vxpose.xlu1.c.b16.start.end [1/1] (short) (narrow) %v186_v18, 16 }
 0x222   : > { %569 = vrot.lane.b32.xlu1 %v174_v11, %s1479_s16 }
 0x227   : > { %522 = vrot.lane.b32.xlu0 %v171_v10, %s1479_s16 }
 0x234   : > { %v199_v19 = vpop.trf.xlu1 }
 0x235   : > { %v261_v20 = vsel %vm259_vm3, %v199_v19, 0 }
 0x236   : > { %1203 = vmatpush3.bf16.msra.mxu0 %v261_v20 }
 0x237   : > { %1214 = vmatprep.subr.bf16.mxu0 %v1477_v14 }
 0x239   : > { %1205 = vmatmul.mubr.msk.bf16.vlgmr.msra.gmra.mrb[0].mxu0 %vm255_vm4, %v171_v10 }
 0x23a   : > { %1216 = vmatprep.mubr.msk.bf16.mxu0 %vm1478_vm2, %v1477_v14 }
 0x280   : > { %v215_v21 = vpop.trf.xlu0 }
 0x281   : > { %v308_v22 = vsel %vm259_vm3, %v215_v21, 0 }
 0x282   : > { %1209 = vmatpush3.bf16.msra.mxu1 %v308_v22 }
 0x283   : > { %1220 = vmatprep.subr.bf16.mxu1 %v1477_v14 }
 0x284   : > { %v231_v23 = vpop.trf.xlu0  ;;  %v247_v24 = vpop.trf.xlu1 }
 0x285   : > { %v355_v25 = vsel %vm259_vm3, %v231_v23, 0  ;;  %1211 = vmatmul.mubr.msk.bf16.vlgmr.msra.gmra.mrb[0].mxu1 %vm255_vm4, %v174_v11  ;;  %v402_v26 = vsel %vm259_vm3, %v247_v24, 0 }
 0x286   : > { %1215 = vmatpush3.bf16.msra.mxu0 %v355_v25  ;;  %1221 = vmatpush3.bf16.msra.mxu1 %v402_v26 }
 0x287   : > { %1222 = vmatprep.mubr.msk.bf16.mxu1 %vm1478_vm2, %v1477_v14  ;;  %1232 = vmatprep.subr.bf16.mxu1 %v1477_v14 }
 0x288   : > { %1226 = vmatprep.subr.bf16.mxu0 %v1477_v14 }
 0x289   : > { %1217 = vmatmul.mubr.msk.bf16.vlgmr.msra.gmra.mrb[4].mxu0 %vm255_vm4, %v1589_v13 }
 0x28a   : > { %1228 = vmatprep.mubr.msk.bf16.mxu0 %vm1478_vm2, %v1477_v14 }
 0x28d   : > { %1223 = vmatmul.mubr.msk.bf16.vlgmr.msra.gmra.mrb[4].mxu1 %vm255_vm4, %v1587_v12 }
 0x28e   : > { %1234 = vmatprep.mubr.msk.bf16.mxu1 %vm1478_vm2, %v1477_v14 }
 0x294   : > { %v570_v27 = vpop.permute.xlu1 %569 }
 0x295   : > { %1233 = vmatpush3.bf16.msra.mxu1 %v570_v27 }
 0x296   : > { %1244 = vmatprep.subr.bf16.mxu1 %v1477_v14 }
 0x299   : > { %v523_v28 = vpop.permute.xlu0 %522 }
 0x29a   : > { %1227 = vmatpush3.bf16.msra.mxu0 %v523_v28 }
 0x29b   : > { %1238 = vmatprep.subr.bf16.mxu0 %v1477_v14 }
 0x30c   : > { %v297_v29 = vpop.f32.mrb[0].mxu0 }
 0x30d   : > { %v1206_v30 = vpop.f32.mrb[1].mxu0  ;;  %v446_v31 = vsel %vm445_vm5, %v297_v29, -inf }
 0x30e   : > { %v300_v32 = vpop.f32.mrb[2].mxu0  ;;  %447 = vmax.xlane.f32.xlu0 %v446_v31 }
 0x30f   : > { %v449_v33 = vsel %vm445_vm5, %v300_v32, -inf  ;;  %v1207_v34 = vpop.f32.mrb[3].mxu0 }
 0x310   : > { %450 = vmax.xlane.f32.xlu1 %v449_v33 }
 0x358   : > { %v344_v35 = vpop.f32.mrb[0].mxu1 }
 0x359   : > { %v1212_v36 = vpop.f32.mrb[1].mxu1  ;;  %v452_v37 = vsel %vm445_vm5, %v344_v35, -inf }
 0x35a   : > { %453 = vmax.xlane.f32.xlu0 %v452_v37  ;;  %v347_v38 = vpop.f32.mrb[2].mxu1 }
 0x35b   : > { %v1213_v39 = vpop.f32.mrb[3].mxu1  ;;  %v455_v40 = vsel %vm445_vm5, %v347_v38, -inf }
 0x35c   : > { %456 = vmax.xlane.f32.xlu1 %v455_v40  ;;  %v391_v41 = vpop.f32.mrb[4].mxu0 }
 0x35d   : > { %v1218_v42 = vpop.f32.mrb[5].mxu0  ;;  %v458_v43 = vsel %vm445_vm5, %v391_v41, -inf }
 0x35e   : > { %459 = vmax.xlane.f32.xlu0 %v458_v43  ;;  %v394_v44 = vpop.f32.mrb[6].mxu0 }
 0x35f   : > { %v1219_v45 = vpop.f32.mrb[7].mxu0  ;;  %v461_v46 = vsel %vm445_vm5, %v394_v44, -inf }
 0x360   : > { %v438_v47 = vpop.f32.mrb[4].mxu1  ;;  %462 = vmax.xlane.f32.xlu1 %v461_v46 }
 0x361   : > { %v1224_v48 = vpop.f32.mrb[5].mxu1  ;;  %v464_v49 = vsel %vm445_vm5, %v438_v47, -inf }
 0x362   : > { %v441_v50 = vpop.f32.mrb[6].mxu1  ;;  %465 = vmax.xlane.f32.xlu0 %v464_v49 }
 0x363   : > { %v1225_v51 = vpop.f32.mrb[7].mxu1  ;;  %v467_v52 = vsel %vm445_vm5, %v441_v50, -inf }
 0x364   : > { %468 = vmax.xlane.f32.xlu1 %v467_v52  ;;  %v731_v52 = vlaneseq }
 0x375   : > { %616 = vrot.lane.b32.xlu1 %v1589_v13, %s1479_s16 }
 0x378   : > { %663 = vrot.lane.b32.xlu0 %v1587_v12, %s1479_s16 }
 0x39b   : > { %v448_v53 = vpop.xlane.xlu0 %447 }
 0x39c   : > { %v470_v54 = vsub.f32 %v297_v29, %v448_v53 }
 0x39d   : > { %v451_v55 = vpop.xlane.xlu1 %450 }
 0x39e   : > { %v478_v56 = vmul.f32 1.442695, %v470_v54  ;;  %v471_v57 = vsub.f32 %v300_v32, %v451_v55 }
 0x3a0   : > { %1307 = vpow2.f32 %v478_v56  ;;  %v480_v58 = vmul.f32 1.442695, %v471_v57 }
 0x3a2   : > { %1309 = vpow2.f32 %v480_v58 }
 0x3aa   : > { %v1308_v59 = vpop.eup %1307 }
 0x3ab   : > { %v494_v60 = vsel %vm445_vm5, %v1308_v59, 0.0 }
 0x3ac   : > { %v1310_v61 = vpop.eup %1309  ;;  %495 = vadd.xlane.f32.xlu1 %v494_v60 }
 0x3ad   : > { %v497_v62 = vsel %vm445_vm5, %v1310_v61, 0.0  ;;  %v518_v63 = vpack.c.bf16 %v1310_v61, %v1308_v59  ;;  %v1481_v61 = vmov 1934713408  }
 0x3ae   : > { %498 = vadd.xlane.f32.xlu0 %v497_v62  ;;  %v761_v62 = vunpack.c.l.s4 %v1481_v61 }
 0x3af   : > { %1229 = vmatmul.mubr.msk.bf16.vlgmr.msra.gmra.mrb[8].mxu0 %vm445_vm5, %v518_v63 }
 0x3b0   : > { %1240 = vmatprep.mubr.msk.bf16.mxu0 %vm1478_vm2, %v1477_v14 }
 0x3e7   : > { %v454_v0 = vpop.xlane.xlu0 %453 }
 0x3e8   : > { %v472_v1 = vsub.f32 %v344_v35, %v454_v0 }
 0x3e9   : > { %v457_v2 = vpop.xlane.xlu1 %456 }
 0x3ea   : > { %v482_v3 = vmul.f32 1.442695, %v472_v1  ;;  %v473_v4 = vsub.f32 %v347_v38, %v457_v2  ;;  %v732_v1 = vshrl.u32 %v731_v52, 7 }
 0x3eb   : > { %v460_v5 = vpop.xlane.xlu0 %459 }
 0x3ec   : > { %1311 = vpow2.f32 %v482_v3  ;;  %v484_v6 = vmul.f32 1.442695, %v473_v4  ;;  %v474_v7 = vsub.f32 %v391_v41, %v460_v5 }
 0x3ed   : > { %v463_v8 = vpop.xlane.xlu1 %462 }
 0x3ee   : > { %1313 = vpow2.f32 %v484_v6  ;;  %v486_v9 = vmul.f32 1.442695, %v474_v7  ;;  %v475_v10 = vsub.f32 %v394_v44, %v463_v8 }
 0x3ef   : > { %v466_v11 = vpop.xlane.xlu0 %465 }
 0x3f0   : > { %1315 = vpow2.f32 %v486_v9  ;;  %v488_v12 = vmul.f32 1.442695, %v475_v10  ;;  %v476_v13 = vsub.f32 %v438_v47, %v466_v11 }
 0x3f1   : > { %v469_v15 = vpop.xlane.xlu1 %468 }
 0x3f2   : > { %1317 = vpow2.f32 %v488_v12  ;;  %v490_v16 = vmul.f32 1.442695, %v476_v13  ;;  %v477_v17 = vsub.f32 %v441_v50, %v469_v15  ;;  %v1480_v50 = vmov 1983009808  }
 0x3f3   : > { %v664_v26 = vpop.permute.xlu0 %663  ;;  %v729_v51 = vunpack.c.l.s4 %v1480_v50  ;;  %v762_v15 = vunpack.c.0.s8 %v761_v62 }
 0x3f4   : > { %1319 = vpow2.f32 %v490_v16  ;;  %v492_v18 = vmul.f32 1.442695, %v477_v17 }
 0x3f5   : > { %v617_v19 = vpop.permute.xlu1 %616  ;;  %v730_v0 = vunpack.c.0.s8 %v729_v51 }
 0x3f6   : > { %v1312_v20 = vpop.eup %1311  ;;  %1321 = vpow2.f32 %v492_v18  ;;  %1239 = vmatpush3.bf16.msra.mxu0 %v617_v19 }
 0x3f7   : > { %v500_v21 = vsel %vm445_vm5, %v1312_v20, 0.0  ;;  %v733_v19 = vsub.s32 %v730_v0, %v732_v1 }
 0x3f8   : > { %v1314_v22 = vpop.eup %1313  ;;  %501 = vadd.xlane.f32.xlu0 %v500_v21 }
 0x3f9   : > { %v503_v23 = vsel %vm445_vm5, %v1314_v22, 0.0  ;;  %v519_v24 = vpack.c.bf16 %v1314_v22, %v1312_v20 }
 0x3fa   : > { %v1316_v25 = vpop.eup %1315  ;;  %504 = vadd.xlane.f32.xlu1 %v503_v23 }
 0x3fb   : > { %1235 = vmatmul.mubr.msk.bf16.vlgmr.msra.gmra.mrb[8].mxu1 %vm445_vm5, %v519_v24  ;;  %v506_v27 = vsel %vm445_vm5, %v1316_v25, 0.0 }
 0x3fc   : > { %v1318_v28 = vpop.eup %1317  ;;  %1245 = vmatpush3.bf16.msra.mxu1 %v664_v26  ;;  %507 = vadd.xlane.f32.xlu0 %v506_v27  ;;  %v765_v27 = vsub.s32 %v762_v15, %v732_v1 }
 0x3fd   : > { %v509_v29 = vsel %vm445_vm5, %v1318_v28, 0.0  ;;  %v520_v30 = vpack.c.bf16 %v1318_v28, %v1316_v25  ;;  %1246 = vmatprep.mubr.msk.bf16.mxu1 %vm1478_vm2, %v1477_v14 }
 0x3fe   : > { %v1320_v31 = vpop.eup %1319  ;;  %510 = vadd.xlane.f32.xlu1 %v509_v29 }
 0x3ff   : > { %1241 = vmatmul.mubr.msk.bf16.vlgmr.msra.gmra.mrb[12].mxu0 %vm445_vm5, %v520_v30  ;;  %v512_v32 = vsel %vm445_vm5, %v1320_v31, 0.0 }
 0x400   : > { %v1322_v33 = vpop.eup %1321  ;;  %513 = vadd.xlane.f32.xlu0 %v512_v32 }
 0x401   : > { %v515_v34 = vsel %vm445_vm5, %v1322_v33, 0.0  ;;  %v521_v35 = vpack.c.bf16 %v1322_v33, %v1320_v31 }
 0x402   : > { %516 = vadd.xlane.f32.xlu1 %v515_v34 }
 0x403   : > { %1247 = vmatmul.mubr.msk.bf16.vlgmr.msra.gmra.mrb[12].mxu1 %vm445_vm5, %v521_v35 }
 0x439   : > { %v496_v14 = vpop.xlane.xlu1 %495 }
 0x43a   : > { %1323 = vrcp.f32 %v496_v14 }
 0x43b   : > { %v499_v40 = vpop.xlane.xlu0 %498 }
 0x444   : > { %v1324_v53 = vpop.eup %1323 }
 0x482   : > { %v562_v36 = vpop.f32.mrb[8].mxu0 }
 0x483   : > { %v1230_v37 = vpop.f32.mrb[9].mxu0  ;;  %v718_v58 = vmul.f32 %v1324_v53, %v562_v36 }
 0x484   : > { %v565_v38 = vpop.f32.mrb[10].mxu0 }
 0x485   : > { %v1231_v39 = vpop.f32.mrb[11].mxu0  ;;  %v502_v41 = vpop.xlane.xlu0 %501 }
 0x487   : > { %v505_v42 = vpop.xlane.xlu1 %504 }
 0x489   : > { %v508_v43 = vpop.xlane.xlu0 %507 }
 0x48a   : > { %1325 = vrcp.f32 %v508_v43 }
 0x48b   : > { %v511_v44 = vpop.xlane.xlu1 %510  ;;  %1327 = vrcp.f32 %v499_v40 }
 0x48c   : > { %1329 = vrcp.f32 %v511_v44 }
 0x48d   : > { %v514_v45 = vpop.xlane.xlu0 %513  ;;  %1331 = vrcp.f32 %v502_v41 }
 0x48e   : > { %1333 = vrcp.f32 %v505_v42 }
 0x48f   : > { %v517_v46 = vpop.xlane.xlu1 %516  ;;  %1335 = vrcp.f32 %v514_v45 }
 0x490   : > { %1337 = vrcp.f32 %v517_v46 }
 0x494   : > { %v1326_v55 = vpop.eup %1325 }
 0x495   : > { %v1328_v57 = vpop.eup %1327 }
 0x496   : > { %v1330_v63 = vpop.eup %1329  ;;  %v719_v4 = vmul.f32 %v1328_v57, %v565_v38 }
 0x497   : > { %v1332_v3 = vpop.eup %1331 }
 0x498   : > { %v1334_v9 = vpop.eup %1333 }
 0x499   : > { %v1336_v11 = vpop.eup %1335 }
 0x49a   : > { %v1338_v17 = vpop.eup %1337 }
 0x4ce   : > { %v609_v47 = vpop.f32.mrb[8].mxu1 }
 0x4cf   : > { %v1236_v48 = vpop.f32.mrb[9].mxu1  ;;  %v720_v18 = vmul.f32 %v1332_v3, %v609_v47 }
 0x4d0   : > { %v612_v49 = vpop.f32.mrb[10].mxu1 }
 0x4d1   : > { %v1237_v54 = vpop.f32.mrb[11].mxu1  ;;  %v721_v22 = vmul.f32 %v1334_v9, %v612_v49 }
 0x4d2   : > { %v656_v56 = vpop.f32.mrb[12].mxu0 }
 0x4d3   : > { %v722_v59 = vmul.f32 %v1326_v55, %v656_v56  ;;  %v1242_v60 = vpop.f32.mrb[13].mxu0 }
 0x4d4   : > { %v659_v2 = vpop.f32.mrb[14].mxu0 }
 0x4d5   : > { %v726_v5 = vcombine.low %v718_v58, %v722_v59  ;;  %v727_v6 = vcombine.high %v718_v58, %v722_v59  ;;  %v723_v7 = vmul.f32 %v1330_v63, %v659_v2  ;;  %v1243_v8 = vpop.f32.mrb[15].mxu0 }
 0x4d6   : > { %v703_v10 = vpop.f32.mrb[12].mxu1 }
 0x4d7   : > { %v794_v12 = vcombine.low %v719_v4, %v723_v7  ;;  %v795_v13 = vcombine.high %v719_v4, %v723_v7  ;;  %v1248_v16 = vpop.f32.mrb[13].mxu1  ;;  %v724_v20 = vmul.f32 %v1336_v11, %v703_v10  ;;  %v734_v30 = vrot.slane %v726_v5, %v733_v19 }
 0x4d8   : > { %v706_v21 = vpop.f32.mrb[14].mxu1  ;;  %v741_v31 = vrot.slane %v727_v6, %v733_v19 }
 0x4d9   : > { %v725_v23 = vmul.f32 %v1338_v17, %v706_v21  ;;  %v1249_v24 = vpop.f32.mrb[15].mxu1  ;;  %v742_v25 = vcombine.low %v720_v18, %v724_v20  ;;  %v743_v26 = vcombine.high %v720_v18, %v724_v20  ;;  %v802_v34 = vrot.slane %v794_v12, %v733_v19 }
 0x4da   : > { %v809_v35 = vrot.slane %v795_v13, %v733_v19 }
 0x4db   : > { %v810_v28 = vcombine.low %v721_v22, %v725_v23  ;;  %v811_v29 = vcombine.high %v721_v22, %v725_v23  ;;  %v750_v32 = vrot.slane %v742_v25, %v733_v19  ;;  %v757_v33 = vrot.slane %v743_v26, %v733_v19 }
 0x4dd   : > { %v818_v36 = vrot.slane %v810_v28, %v733_v19  ;;  %v825_v37 = vrot.slane %v811_v29, %v733_v19  ;;  %v758_v38 = vcombine.low %v734_v30, %v750_v32  ;;  %v759_v39 = vcombine.high %v734_v30, %v750_v32 }
 0x4de   : > { %v774_v40 = vcombine.low %v741_v31, %v757_v33  ;;  %v775_v14 = vcombine.high %v741_v31, %v757_v33 }
 0x4df   : > { %v826_v41 = vcombine.low %v802_v34, %v818_v36  ;;  %v827_v42 = vcombine.high %v802_v34, %v818_v36  ;;  %v842_v43 = vcombine.low %v809_v35, %v825_v37  ;;  %v843_v44 = vcombine.high %v809_v35, %v825_v37 }
 0x4e0   : > { %v766_v45 = vrot.slane %v758_v38, %v765_v27  ;;  %v773_v46 = vrot.slane %v759_v39, %v765_v27  ;;  %v782_v47 = vrot.slane %v774_v40, %v765_v27  ;;  %v789_v48 = vrot.slane %v775_v14, %v765_v27 }
 0x4e1   : > { %v834_v49 = vrot.slane %v826_v41, %v765_v27  ;;  %v841_v50 = vrot.slane %v827_v42, %v765_v27  ;;  %v850_v51 = vrot.slane %v842_v43, %v765_v27  ;;  %v857_v52 = vrot.slane %v843_v44, %v765_v27 }
 0x4e2   : > { %v862_v53 = vcombine.low %v766_v45, %v773_v46  ;;  %v1160_v54 = vcombine.high %v766_v45, %v773_v46  ;;  %v878_v55 = vcombine.low %v782_v47, %v789_v48  ;;  %v1161_v56 = vcombine.high %v782_v47, %v789_v48  ;;  %v1339_v48 = vld [vmem:[#allocation9] sm:$0xff] (%p165_p4)  }
 0x4e3   : > { %v930_v57 = vcombine.low %v834_v49, %v841_v50  ;;  %v1162_v58 = vcombine.high %v834_v49, %v841_v50  ;;  %v946_v59 = vcombine.low %v850_v51, %v857_v52  ;;  %v1163_v60 = vcombine.high %v850_v51, %v857_v52  ;;  %v1340_v49 = vld [vmem:[#allocation9 + $0x8] sm:$0xff] (%p165_p4)   ;;  %1250 = vmatprep.subr.bf16.mxu0 (%p165_p4), %v1339_v48  ;;  %v1165_v52 = vld [vmem:[#allocation10] ss:$0 sm:$0xff] (%p165_p4) }
 0x4e4   : > { %v869_v61 = vrot.slane %v862_v53, %v733_v19  ;;  %v877_v62 = vrot.slane %v1160_v54, %v733_v19  ;;  %v885_v63 = vrot.slane %v878_v55, %v733_v19  ;;  %v893_v0 = vrot.slane %v1161_v56, %v733_v19  ;;  %1251 = vmatpush3.bf16.msra.mxu0 (%p165_p4), %v1339_v48 }
 0x4e5   : > { %v937_v1 = vrot.slane %v930_v57, %v733_v19  ;;  %v945_v2 = vrot.slane %v1162_v58, %v733_v19  ;;  %v953_v3 = vrot.slane %v946_v59, %v733_v19  ;;  %v961_v4 = vrot.slane %v1163_v60, %v733_v19  ;;  %1252 = vmatprep.subr.bf16.mxu0 (%p165_p4), %v1340_v49 }
 0x4e6   : > { %v895_v5 = vcombine.high %v869_v61, %v877_v62  ;;  %v911_v6 = vcombine.high %v885_v63, %v893_v0  ;;  %v894_v7 = vcombine.low %v869_v61, %v877_v62  ;;  %v910_v8 = vcombine.low %v885_v63, %v893_v0 }
 0x4e7   : > { %v963_v9 = vcombine.high %v937_v1, %v945_v2  ;;  %v979_v10 = vcombine.high %v953_v3, %v961_v4  ;;  %v962_v11 = vcombine.low %v937_v1, %v945_v2  ;;  %v978_v12 = vcombine.low %v953_v3, %v961_v4 }
 0x4e8   : > { %v909_v13 = vrot.slane %v895_v5, %v765_v27  ;;  %v925_v15 = vrot.slane %v911_v6, %v765_v27  ;;  %v902_v16 = vrot.slane %v894_v7, %v765_v27  ;;  %v918_v17 = vrot.slane %v910_v8, %v765_v27  ;;  %1253 = vmatpush3.bf16.msra.mxu0 (%p165_p4), %v1340_v49 }
 0x4e9   : > { %v977_v18 = vrot.slane %v963_v9, %v765_v27  ;;  %v993_v20 = vrot.slane %v979_v10, %v765_v27  ;;  %v970_v21 = vrot.slane %v962_v11, %v765_v27  ;;  %v986_v22 = vrot.slane %v978_v12, %v765_v27 }
 0x4ea   : > { %v928_v23 = vcombine.low %v909_v13, %v925_v15  ;;  %v927_v24 = vcombine.high %v902_v16, %v918_v17  ;;  %v929_v25 = vcombine.high %v909_v13, %v925_v15  ;;  %v926_v19 = vcombine.low %v902_v16, %v918_v17 }
 0x4eb   : > { %v996_v26 = vcombine.low %v977_v18, %v993_v20  ;;  %v995_v28 = vcombine.high %v970_v21, %v986_v22  ;;  %v997_v29 = vcombine.high %v977_v18, %v993_v20  ;;  %v994_v30 = vcombine.low %v970_v21, %v986_v22 }
 0x4ed   : > { %v1297_v31 = vpack.i.bf16 %v996_v26, %v928_v23  ;;  %v1292_v32 = vpack.i.bf16 %v995_v28, %v927_v24  ;;  %v1302_v33 = vpack.i.bf16 %v997_v29, %v929_v25 }
 0x4ef   : > { %1298 = vrot.lane.b32.xlu1 %v1297_v31, %s1482_s17  ;;  %1293 = vrot.lane.b32.xlu0 %v1292_v32, %s1483_s19 }
 0x4f3   : > { %1303 = vrot.lane.b32.xlu1 %v1302_v33, %s1484_s20 }
 0x561   : > { %v1299_v34 = vpop.permute.xlu1 %1298  ;;  %v1294_v35 = vpop.permute.xlu0 %1293 }
 0x562   : > { %v1296_v27 = vunpack.i.h.bf16 %v1294_v35  ;;  %v1295_v36 = vunpack.i.l.bf16 %v1294_v35  ;;  %v1301_v37 = vunpack.i.h.bf16 %v1299_v34  ;;  %v1300_v38 = vunpack.i.l.bf16 %v1299_v34 }
 0x564   : > { %v1023_v39 = vsel %vm255_vm4, %v994_v30, %v1296_v27  ;;  %v1022_v40 = vsel %vm255_vm4, %v926_v19, %v1295_v36 }
 0x565   : > { %v1304_v14 = vpop.permute.xlu1 %1303  ;;  %v1024_v43 = vsel %vm445_vm5, %v1022_v40, %v1300_v38  ;;  %v1025_v44 = vsel %vm445_vm5, %v1023_v39, %v1301_v37  ;;  %167 = sbr.rel (!%p165_p4) target bundleno = 301 (0x12d), region = 61 }
 0x566   : > { %v1306_v41 = vunpack.i.h.bf16 %v1304_v14  ;;  %v1305_v42 = vunpack.i.l.bf16 %v1304_v14 }
 0x568   : > { %v1027_v45 = vsel %vm1026_vm6, %v1024_v43, %v1305_v42  ;;  %v1028_v46 = vsel %vm1026_vm6, %v1025_v44, %v1306_v41 }
 0x569   : > { %v1029_v47 = vpack.c.bf16 %v1028_v46, %v1027_v45 }
 0x56b   : > { %1032 = vst.msk [vmem:[%s1031_s21] sm:$0xff] %vm102_vm0, %v1029_v47 }
 0x572   :  { %v1033_v50 = vld [vmem:[#allocation3] sm:$0xff]  ;;  %v1034_v51 = vld [vmem:[#allocation3 + $0x8] sm:$0xff] }
 0x573   :  { %1254 = vmatprep.mubr.msk.bf16.mxu0 %vm102_vm0, %v1033_v50 }
 0x574   :  { %1255 = vmatmul.mubr.msk.bf16.vlgmr.msra.gmra.mrb[0].mxu0 %vm102_vm0, %v1034_v51 }
 0x647   :  { %v1256_v53 = vpop.f32.mrb[0].mxu0 }
 0x648   :  { %v1107_v54 = vadd.f32 %v1256_v53, %v1165_v52  ;;  %v1098_v55 = vpop.f32.mrb[1].mxu0 }
 0x649   :  { %v1099_v56 = vadd.f32 %v1165_v52, %v1098_v55  ;;  %v1257_v57 = vpop.f32.mrb[2].mxu0 }
 0x64a   :  { %1115 = vst.msk [vmem:[#allocation12 + $0x10] sm:$0xff] %vm102_vm0, %v1107_v54  ;;  %v1110_v58 = vadd.f32 %v1257_v57, %v1165_v52  ;;  %v1101_v59 = vpop.f32.mrb[3].mxu0 }
 0x64b   :  { %1113 = vst.msk [vmem:[#allocation12] sm:$0xff] %vm102_vm0, %v1099_v56  ;;  %v1102_v60 = vadd.f32 %v1165_v52, %v1101_v59 }
 0x64c   :  { %1116 = vst.msk [vmem:[#allocation12 + $0x18] sm:$0xff] %vm102_vm0, %v1110_v58 }
 0x64d   :  { %1114 = vst.msk [vmem:[#allocation12 + $0x8] sm:$0xff] %vm102_vm0, %v1102_v60 }
 0x64e   :  { %1440 = shalt.err (!%p1437_p9)
}
 0x64f   :  { %s1441_s18 = scalar_lea.hbm %s1685_s4, 512 }
 0x650   :  { %p1442_p10 = scmp.ne.s32.totalorder %s1685_s4, %s1441_s18  ;;  %p1445_p11 = scmp.lt.u32.totalorder %s1441_s18, %s1685_s4 }
 0x652   :  { %p1447_p12 = pnand %p1445_p11, %p1442_p10 }
 0x654   :  { %1450 = shalt.err (!%p1447_p12)
}
 0x655   :  { %s1486_s6 = smov 128   ;;  %s1487_s7 = smov 8  }
 0x656   :  { %1128 = dma.vmem_to_hbm [thread:$0]  %s1123_s23, 512, %s1685_s4, [#allocation6], %s1486_s6, %s1486_s6, %s1487_s7  }
 0x657   :  { %1461 = dma.done.wait [#allocation6], 512  }
 0x658   :  { %1462 = vsyncadd [#allocation6], 4294966784 }
 0x659   :  { %1132 = vsyncpa [#allocation5], 1 }
 0x65a   :  { %1133 = vsyncpa [#allocation8], 1 }
 0x65b   :  { %1134 = vsyncpa [#allocation11], 1 }
 0x65c   :  { %1135 = vsyncpa [#allocation6], 1 }

</bundles_post_ra>
